<compile_context>
chip_gen: v7x
topology: tpu7x:2x2x1
jax: 0.10.0
libtpu: 0.0.40
codegen_flags: <defaults>
</compile_context>

<pallas_src>
import jax
import jax.numpy as jnp
import numpy as np
from jax.experimental import pallas as pl
from jax.experimental.pallas import tpu as pltpu


LN_EPS = 1e-12


def _seqcls_fused_kernel(ids_ref, seqs_ref, mask_ref, tab_ref, pos_ref,
                         gamma_ref, beta_ref, w1_ref, b1_ref, w2_ref, b2_ref,
                         logits_ref):
    # ids_ref/seqs_ref: (TB, S) int32   mask_ref: (TB, S) f32 (1 = valid token)
    # tab_ref: (Vc, D) merged [tokens_embed ; sequence_embed]   pos_ref: (S, D)
    # gamma/beta: (1, D)   w1: (D, H) b1: (1, H) w2: (H, L) b2: (1, L)
    # logits_ref: (TB, L)
    TB, S = ids_ref.shape
    Vc, D = tab_ref.shape
    N = TB * S

    # --- merged embedding gather: ONE one-hot x [tok_tab ; seq_tab] matmul.
    # ids hit rows [0, V_tok), offset seqs hit rows [Vt_p, Vc): disjoint ranges,
    # so OR-ing the one-hots == summing both gathers in a single MXU pass.
    lane = jax.lax.broadcasted_iota(jnp.int32, (1, 1, Vc), 2)          # tiny row
    onehot = ((ids_ref[...][:, :, None] == lane) |
              (seqs_ref[...][:, :, None] == lane)).astype(jnp.float32)  # (TB,S,Vc)
    feat = jnp.dot(onehot.reshape(N, Vc), tab_ref[...],
                   preferred_element_type=jnp.float32)                  # (N, D)

    x = feat.reshape(TB, S, D) + pos_ref[...]                           # + positions

    # --- tokens_layernorm (eps=1e-12), centered two-pass variance.
    mean = jnp.mean(x, axis=-1, keepdims=True)
    xc = x - mean
    var = jnp.mean(xc * xc, axis=-1, keepdims=True)
    xn = xc * jax.lax.rsqrt(var + LN_EPS)
    xn = xn * gamma_ref[...] + beta_ref[...]            # (1, D) lane-broadcast
    # tokens_dropout: identity in eval mode.

    # --- masked mean pooling over the sequence axis.
    m = mask_ref[...]                                   # (TB, S)
    pooled = jnp.sum(xn * m[:, :, None], axis=1)        # (TB, D)
    # PyTorch module asserts num_of_tokens != 0; clamp instead of asserting.
    cnt = jnp.maximum(jnp.sum(m, axis=1, keepdims=True), 1.0)           # (TB, 1)
    pooled = pooled / cnt

    # --- SequenceClassificationHead: Linear -> ReLU -> Dropout(id) -> Linear.
    h = jnp.maximum(
        jnp.dot(pooled, w1_ref[...], preferred_element_type=jnp.float32)
        + b1_ref[...], 0.0)
    logits = (jnp.dot(h, w2_ref[...], preferred_element_type=jnp.float32)
              + b2_ref[...])
    logits_ref[...] = logits.astype(logits_ref.dtype)


def seq_cls_forward_pallas(input_ids, seqs, valid_mask,
                           tokens_embed, sequence_embed, position_embed,
                           gamma, beta, w1, b1, w2, b2, *, batch_tile=256):
    """Fused embedding-gather + LayerNorm + masked mean-pool + MLP head."""
    B, S = input_ids.shape
    V_tok, D = tokens_embed.shape
    V_aa = sequence_embed.shape[0]
    H = w1.shape[1]
    L = w2.shape[1]

    round8 = lambda v: ((v + 7) // 8) * 8
    Vt_p, Va_p = round8(V_tok), round8(V_aa)
    Vc = Vt_p + Va_p

    # Row-concatenated [tokens_embed ; sequence_embed] table. Padded rows are
    # never addressed (ids < V_tok, offset seqs < Vt_p + V_aa).
    tab = jnp.zeros((Vc, D), jnp.float32)
    tab = tab.at[:V_tok].set(tokens_embed.astype(jnp.float32))
    tab = tab.at[Vt_p:Vt_p + V_aa].set(sequence_embed.astype(jnp.float32))

    pos_s = position_embed[:S].astype(jnp.float32)        # position_ids = arange(S)
    ids = input_ids.astype(jnp.int32)
    seqs_off = seqs.astype(jnp.int32) + Vt_p               # shift into table rows
    mask = valid_mask.astype(jnp.float32)                  # (B, S) lane-packed

    # --- batch tiling --------------------------------------------------------
    # Big tiles amortize the ~0.35us per-grid-step overhead; cap so in-kernel
    # transients (one-hot + a few feature copies) stay around <= 8 MiB.
    assert batch_tile % 8 == 0
    if B <= batch_tile:
        TB = B
    else:
        per_row_bytes = S * (Vc + 4 * D) * 4
        cap = max(8, (8 * 1024 * 1024 // per_row_bytes) // 8 * 8)
        TB = min(batch_tile, cap)
    Bp = pl.cdiv(B, TB) * TB
    if Bp != B:  # pad with valid row-0 indices, mask = 0 -> padded rows are benign
        pad = Bp - B
        ids = jnp.pad(ids, ((0, pad), (0, 0)))
        seqs_off = jnp.pad(seqs_off, ((0, pad), (0, 0)), constant_values=Vt_p)
        mask = jnp.pad(mask, ((0, pad), (0, 0)))
    grid = (Bp // TB,)
    # NOTE(v7x): pick batch_tile so Bp // TB >= 2 (ideally even) or the second
    # TensorCore idles; "parallel" is a no-op on single-TC v5e/v6e.
    # TODO(synk): with D=32 all VPU work and the (TB, L=4) store run at <=25% lane
    # utilization; a transposed / token-packed layout would help if this stage
    # ever dominates at very large B.

    logits = pl.pallas_call(
        _seqcls_fused_kernel,
        out_shape=jax.ShapeDtypeStruct((Bp, L), jnp.float32),
        grid=grid,
        in_specs=[
            pl.BlockSpec((TB, S), lambda i: (i, 0)),      # input_ids
            pl.BlockSpec((TB, S), lambda i: (i, 0)),      # seqs (pre-offset)
            pl.BlockSpec((TB, S), lambda i: (i, 0)),      # valid mask (lane-packed)
            pl.BlockSpec((Vc, D), lambda i: (0, 0)),      # merged embed table (resident)
            pl.BlockSpec((S, D), lambda i: (0, 0)),       # position_embed[:S] (resident)
            pl.BlockSpec((1, D), lambda i: (0, 0)),       # LayerNorm gamma
            pl.BlockSpec((1, D), lambda i: (0, 0)),       # LayerNorm beta
            pl.BlockSpec((D, H), lambda i: (0, 0)),       # head w1
            pl.BlockSpec((1, H), lambda i: (0, 0)),       # head b1
            pl.BlockSpec((H, L), lambda i: (0, 0)),       # head w2
            pl.BlockSpec((1, L), lambda i: (0, 0)),       # head b2
        ],
        out_specs=pl.BlockSpec((TB, L), lambda i: (i, 0)),
        compiler_params=pltpu.CompilerParams(
            dimension_semantics=("parallel",),            # megacore-shard batch tiles
            vmem_limit_bytes=32 * 1024 * 1024,            # honest budget; fits v7x 64MiB
        ),
    )(ids, seqs_off, mask, tab, pos_s,
      gamma.astype(jnp.float32), beta.astype(jnp.float32),
      w1.astype(jnp.float32), b1.astype(jnp.float32),
      w2.astype(jnp.float32), b2.astype(jnp.float32))

    return logits[:B] if Bp != B else logits


def seq_cls_forward_ref(input_ids, seqs, valid_mask,
                        tokens_embed, sequence_embed, position_embed,
                        gamma, beta, w1, b1, w2, b2):
    # Pure-JAX reference mirroring the PyTorch module (global path, eval mode).
    S = input_ids.shape[1]
    feature = (tokens_embed[input_ids]
               + position_embed[:S][None, :, :]
               + sequence_embed[seqs]).astype(jnp.float32)
    mean = jnp.mean(feature, axis=-1, keepdims=True)
    var = jnp.mean((feature - mean) ** 2, axis=-1, keepdims=True)
    xn = (feature - mean) / jnp.sqrt(var + LN_EPS) * gamma + beta
    vm = valid_mask.astype(jnp.float32)
    pooled = jnp.sum(xn * vm[:, :, None], axis=1) / jnp.sum(vm, axis=1, keepdims=True)
    h = jnp.maximum(jnp.dot(pooled, w1, precision=jax.lax.Precision.HIGHEST) + b1, 0.0)
    return jnp.dot(h, w2, precision=jax.lax.Precision.HIGHEST) + b2


if __name__ == "__main__":
    # Small shapes consistent with the module.
    B, S, D, H, L = 2, 8, 32, 32, 4       # batch, seq, d_model, hidden_size, num_labels
    NUM_TOKENS = 16                       # token vocab (codebook)
    NUM_AA = 27                           # sequence_embed vocab (26 + 1)
    MAX_POS = 700                         # max_position_embeddings

    key = jax.random.PRNGKey(0)
    keys = jax.random.split(key, 12)

    # Deterministic synthetic parameters (shapes from __init__).
    tokens_embed = jax.random.normal(keys[0], (NUM_TOKENS, D), jnp.float32) * 0.02
    sequence_embed = jax.random.normal(keys[1], (NUM_AA, D), jnp.float32) * 0.02
    position_embed = jax.random.normal(keys[2], (MAX_POS, D), jnp.float32) * 0.02
    gamma = jnp.ones((1, D), jnp.float32)
    beta = jnp.zeros((1, D), jnp.float32)
    w1 = jax.random.normal(keys[3], (D, H), jnp.float32) * 0.05
    b1 = jax.random.normal(keys[4], (1, H), jnp.float32) * 0.01
    w2 = jax.random.normal(keys[5], (H, L), jnp.float32) * 0.05
    b2 = jax.random.normal(keys[6], (1, L), jnp.float32) * 0.01

    # --- case 1: tiny batch (single block, TB == B) --------------------------
    input_ids = jax.random.randint(keys[7], (B, S), 0, NUM_TOKENS)
    seqs = jax.random.randint(keys[8], (B, S), 0, NUM_AA)
    input_mask = jnp.zeros((B, S), bool).at[1, S - 2:].set(True)   # True = padded
    valid_mask = (~input_mask).astype(jnp.float32)

    logits = seq_cls_forward_pallas(input_ids, seqs, valid_mask,
                                    tokens_embed, sequence_embed, position_embed,
                                    gamma, beta, w1, b1, w2, b2)
    logits = jax.block_until_ready(logits)
    logits_ref = seq_cls_forward_ref(input_ids, seqs, valid_mask,
                                     tokens_embed, sequence_embed, position_embed,
                                     gamma, beta, w1, b1, w2, b2)
    np.testing.assert_allclose(np.asarray(logits), np.asarray(logits_ref),
                               rtol=1e-4, atol=1e-5)

    # --- case 2: batch > tile (multi-block grid + batch-padding path) --------
    B2 = 12
    input_ids2 = jax.random.randint(keys[9], (B2, S), 0, NUM_TOKENS)
    seqs2 = jax.random.randint(keys[10], (B2, S), 0, NUM_AA)
    input_mask2 = jnp.zeros((B2, S), bool).at[B2 // 2:, S - 3:].set(True)
    valid_mask2 = (~input_mask2).astype(jnp.float32)

    logits2 = seq_cls_forward_pallas(input_ids2, seqs2, valid_mask2,
                                     tokens_embed, sequence_embed, position_embed,
                                     gamma, beta, w1, b1, w2, b2, batch_tile=8)
    logits2 = jax.block_until_ready(logits2)
    logits2_ref = seq_cls_forward_ref(input_ids2, seqs2, valid_mask2,
                                      tokens_embed, sequence_embed, position_embed,
                                      gamma, beta, w1, b1, w2, b2)
    np.testing.assert_allclose(np.asarray(logits2), np.asarray(logits2_ref),
                               rtol=1e-4, atol=1e-5)

    print("KERNEL_OK")
</pallas_src>

<mosaic_0001>
module attributes {stable_mosaic.version = 11 : i64} {
  func.func @_seqcls_fused_kernel(%arg0: i32, %arg1: memref<2x8xi32, #tpu.memory_space<vmem>>, %arg2: memref<2x8xi32, #tpu.memory_space<vmem>>, %arg3: memref<2x8xf32, #tpu.memory_space<vmem>>, %arg4: memref<48x32xf32, #tpu.memory_space<vmem>>, %arg5: memref<8x32xf32, #tpu.memory_space<vmem>>, %arg6: memref<1x32xf32, #tpu.memory_space<vmem>>, %arg7: memref<1x32xf32, #tpu.memory_space<vmem>>, %arg8: memref<32x32xf32, #tpu.memory_space<vmem>>, %arg9: memref<1x32xf32, #tpu.memory_space<vmem>>, %arg10: memref<32x4xf32, #tpu.memory_space<vmem>>, %arg11: memref<1x4xf32, #tpu.memory_space<vmem>>, %arg12: memref<2x4xf32, #tpu.memory_space<vmem>>) attributes {dimension_semantics = [#tpu.dimension_semantics<parallel>], iteration_bounds = array<i64: 1>, scalar_prefetch = 0 : i64, scratch_operands = 0 : i64, tpu.core_type = #tpu.core_type<tc>, window_params = [{transform_indices = @transform_0, window_bounds = array<i64: 2, 8>}, {transform_indices = @transform_1, window_bounds = array<i64: 2, 8>}, {transform_indices = @transform_2, window_bounds = array<i64: 2, 8>}, {pipeline_mode = #tpu.pipeline_mode<synchronous>, transform_indices = @transform_3, window_bounds = array<i64: 48, 32>}, {pipeline_mode = #tpu.pipeline_mode<synchronous>, transform_indices = @transform_4, window_bounds = array<i64: 8, 32>}, {pipeline_mode = #tpu.pipeline_mode<synchronous>, transform_indices = @transform_5, window_bounds = array<i64: 1, 32>}, {pipeline_mode = #tpu.pipeline_mode<synchronous>, transform_indices = @transform_6, window_bounds = array<i64: 1, 32>}, {pipeline_mode = #tpu.pipeline_mode<synchronous>, transform_indices = @transform_7, window_bounds = array<i64: 32, 32>}, {pipeline_mode = #tpu.pipeline_mode<synchronous>, transform_indices = @transform_8, window_bounds = array<i64: 1, 32>}, {pipeline_mode = #tpu.pipeline_mode<synchronous>, transform_indices = @transform_9, window_bounds = array<i64: 32, 4>}, {pipeline_mode = #tpu.pipeline_mode<synchronous>, transform_indices = @transform_10, window_bounds = array<i64: 1, 4>}, {transform_indices = @transform_11, window_bounds = array<i64: 2, 4>}]} {
    %0 = tpu.iota {dimensions = array<i32: 2>} : vector<1x1x48xi32>
    %c0 = arith.constant 0 : index
    %c0_0 = arith.constant 0 : index
    %1 = vector.load %arg1[%c0, %c0_0] : memref<2x8xi32, #tpu.memory_space<vmem>>, vector<2x8xi32>
    %2 = vector.shape_cast %1 : vector<2x8xi32> to vector<2x8x1xi32>
    %3 = vector.broadcast %2 : vector<2x8x1xi32> to vector<2x8x48xi32>
    %4 = vector.broadcast %0 : vector<1x1x48xi32> to vector<2x8x48xi32>
    %5 = arith.cmpi eq, %3, %4 : vector<2x8x48xi32>
    %c0_1 = arith.constant 0 : index
    %c0_2 = arith.constant 0 : index
    %6 = vector.load %arg2[%c0_1, %c0_2] : memref<2x8xi32, #tpu.memory_space<vmem>>, vector<2x8xi32>
    %7 = vector.shape_cast %6 : vector<2x8xi32> to vector<2x8x1xi32>
    %8 = vector.broadcast %7 : vector<2x8x1xi32> to vector<2x8x48xi32>
    %9 = vector.broadcast %0 : vector<1x1x48xi32> to vector<2x8x48xi32>
    %10 = arith.cmpi eq, %8, %9 : vector<2x8x48xi32>
    %11 = arith.ori %5, %10 : vector<2x8x48xi1>
    %12 = arith.extui %11 : vector<2x8x48xi1> to vector<2x8x48xi32>
    %13 = arith.sitofp %12 : vector<2x8x48xi32> to vector<2x8x48xf32>
    %14 = vector.shape_cast %13 : vector<2x8x48xf32> to vector<16x48xf32>
    %c0_3 = arith.constant 0 : index
    %c0_4 = arith.constant 0 : index
    %15 = vector.load %arg4[%c0_3, %c0_4] : memref<48x32xf32, #tpu.memory_space<vmem>>, vector<48x32xf32>
    %cst = arith.constant dense<0.000000e+00> : vector<16x32xf32>
    %16 = tpu.matmul %14, %15, %cst {dimension_numbers = #tpu.dot_dimension_numbers<[1], [0], [0], [1], [0, 0, 1, 1], [], []>} : vector<16x48xf32>, vector<48x32xf32>, vector<16x32xf32> -> vector<16x32xf32>
    %17 = vector.shape_cast %16 : vector<16x32xf32> to vector<2x8x32xf32>
    %c0_5 = arith.constant 0 : index
    %c0_6 = arith.constant 0 : index
    %18 = vector.load %arg5[%c0_5, %c0_6] : memref<8x32xf32, #tpu.memory_space<vmem>>, vector<8x32xf32>
    %19 = vector.shape_cast %18 : vector<8x32xf32> to vector<1x8x32xf32>
    %20 = vector.broadcast %19 : vector<1x8x32xf32> to vector<2x8x32xf32>
    %21 = arith.addf %17, %20 : vector<2x8x32xf32>
    %cst_7 = arith.constant dense<0.000000e+00> : vector<2x8xf32>
    %22 = vector.multi_reduction <add>, %21, %cst_7 [2] : vector<2x8x32xf32> to vector<2x8xf32>
    %23 = vector.shape_cast %22 : vector<2x8xf32> to vector<2x8x1xf32>
    %cst_8 = arith.constant 3.200000e+01 : f32
    %24 = vector.broadcast %cst_8 : f32 to vector<2x8x1xf32>
    %25 = arith.divf %23, %24 : vector<2x8x1xf32>
    %26 = vector.broadcast %25 : vector<2x8x1xf32> to vector<2x8x32xf32>
    %27 = arith.subf %21, %26 : vector<2x8x32xf32>
    %28 = arith.mulf %27, %27 : vector<2x8x32xf32>
    %cst_9 = arith.constant dense<0.000000e+00> : vector<2x8xf32>
    %29 = vector.multi_reduction <add>, %28, %cst_9 [2] : vector<2x8x32xf32> to vector<2x8xf32>
    %30 = vector.shape_cast %29 : vector<2x8xf32> to vector<2x8x1xf32>
    %cst_10 = arith.constant 3.200000e+01 : f32
    %31 = vector.broadcast %cst_10 : f32 to vector<2x8x1xf32>
    %32 = arith.divf %30, %31 : vector<2x8x1xf32>
    %cst_11 = arith.constant 9.99999996E-13 : f32
    %33 = vector.broadcast %cst_11 : f32 to vector<2x8x1xf32>
    %34 = arith.addf %32, %33 : vector<2x8x1xf32>
    %35 = math.rsqrt %34 : vector<2x8x1xf32>
    %36 = vector.broadcast %35 : vector<2x8x1xf32> to vector<2x8x32xf32>
    %37 = arith.mulf %27, %36 : vector<2x8x32xf32>
    %c0_12 = arith.constant 0 : index
    %c0_13 = arith.constant 0 : index
    %38 = vector.load %arg6[%c0_12, %c0_13] : memref<1x32xf32, #tpu.memory_space<vmem>>, vector<1x32xf32>
    %39 = vector.shape_cast %38 : vector<1x32xf32> to vector<1x1x32xf32>
    %40 = vector.broadcast %39 : vector<1x1x32xf32> to vector<2x8x32xf32>
    %41 = arith.mulf %37, %40 : vector<2x8x32xf32>
    %c0_14 = arith.constant 0 : index
    %c0_15 = arith.constant 0 : index
    %42 = vector.load %arg7[%c0_14, %c0_15] : memref<1x32xf32, #tpu.memory_space<vmem>>, vector<1x32xf32>
    %43 = vector.shape_cast %42 : vector<1x32xf32> to vector<1x1x32xf32>
    %44 = vector.broadcast %43 : vector<1x1x32xf32> to vector<2x8x32xf32>
    %45 = arith.addf %41, %44 : vector<2x8x32xf32>
    %c0_16 = arith.constant 0 : index
    %c0_17 = arith.constant 0 : index
    %46 = vector.load %arg3[%c0_16, %c0_17] : memref<2x8xf32, #tpu.memory_space<vmem>>, vector<2x8xf32>
    %47 = vector.shape_cast %46 : vector<2x8xf32> to vector<2x8x1xf32>
    %48 = vector.broadcast %47 : vector<2x8x1xf32> to vector<2x8x32xf32>
    %49 = arith.mulf %45, %48 : vector<2x8x32xf32>
    %cst_18 = arith.constant dense<0.000000e+00> : vector<2x32xf32>
    %50 = vector.multi_reduction <add>, %49, %cst_18 [1] : vector<2x8x32xf32> to vector<2x32xf32>
    %cst_19 = arith.constant dense<0.000000e+00> : vector<2xf32>
    %51 = vector.multi_reduction <add>, %46, %cst_19 [1] : vector<2x8xf32> to vector<2xf32>
    %52 = vector.shape_cast %51 : vector<2xf32> to vector<2x1xf32>
    %cst_20 = arith.constant 1.000000e+00 : f32
    %53 = vector.broadcast %cst_20 : f32 to vector<2x1xf32>
    %54 = arith.maximumf %52, %53 : vector<2x1xf32>
    %55 = vector.broadcast %54 : vector<2x1xf32> to vector<2x32xf32>
    %56 = arith.divf %50, %55 : vector<2x32xf32>
    %c0_21 = arith.constant 0 : index
    %c0_22 = arith.constant 0 : index
    %57 = vector.load %arg8[%c0_21, %c0_22] : memref<32x32xf32, #tpu.memory_space<vmem>>, vector<32x32xf32>
    %cst_23 = arith.constant dense<0.000000e+00> : vector<2x32xf32>
    %58 = tpu.matmul %56, %57, %cst_23 {dimension_numbers = #tpu.dot_dimension_numbers<[1], [0], [0], [1], [0, 0, 1, 1], [], []>} : vector<2x32xf32>, vector<32x32xf32>, vector<2x32xf32> -> vector<2x32xf32>
    %c0_24 = arith.constant 0 : index
    %c0_25 = arith.constant 0 : index
    %59 = vector.load %arg9[%c0_24, %c0_25] : memref<1x32xf32, #tpu.memory_space<vmem>>, vector<1x32xf32>
    %60 = vector.broadcast %59 : vector<1x32xf32> to vector<2x32xf32>
    %61 = arith.addf %58, %60 : vector<2x32xf32>
    %cst_26 = arith.constant 0.000000e+00 : f32
    %62 = vector.broadcast %cst_26 : f32 to vector<2x32xf32>
    %63 = arith.maximumf %61, %62 : vector<2x32xf32>
    %c0_27 = arith.constant 0 : index
    %c0_28 = arith.constant 0 : index
    %64 = vector.load %arg10[%c0_27, %c0_28] : memref<32x4xf32, #tpu.memory_space<vmem>>, vector<32x4xf32>
    %cst_29 = arith.constant dense<0.000000e+00> : vector<2x4xf32>
    %65 = tpu.matmul %63, %64, %cst_29 {dimension_numbers = #tpu.dot_dimension_numbers<[1], [0], [0], [1], [0, 0, 1, 1], [], []>} : vector<2x32xf32>, vector<32x4xf32>, vector<2x4xf32> -> vector<2x4xf32>
    %c0_30 = arith.constant 0 : index
    %c0_31 = arith.constant 0 : index
    %66 = vector.load %arg11[%c0_30, %c0_31] : memref<1x4xf32, #tpu.memory_space<vmem>>, vector<1x4xf32>
    %67 = vector.broadcast %66 : vector<1x4xf32> to vector<2x4xf32>
    %68 = arith.addf %65, %67 : vector<2x4xf32>
    %c0_32 = arith.constant 0 : index
    %c0_33 = arith.constant 0 : index
    %69 = vector.load %arg12[%c0_32, %c0_33] : memref<2x4xf32, #tpu.memory_space<vmem>>, vector<2x4xf32>
    tpu.vector_store %arg12[%c0_32, %c0_33], %68 {strides = array<i32>} : memref<2x4xf32, #tpu.memory_space<vmem>>, vector<2x4xf32>,
    return
  }
  func.func @transform_0(%arg0: i32) -> (i32, i32) {
    %c0_i32 = arith.constant 0 : i32
    %c0_i32_0 = arith.constant 0 : i32
    return %arg0, %c0_i32 : i32, i32
  }
  func.func @transform_1(%arg0: i32) -> (i32, i32) {
    %c0_i32 = arith.constant 0 : i32
    %c0_i32_0 = arith.constant 0 : i32
    return %arg0, %c0_i32 : i32, i32
  }
  func.func @transform_2(%arg0: i32) -> (i32, i32) {
    %c0_i32 = arith.constant 0 : i32
    %c0_i32_0 = arith.constant 0 : i32
    return %arg0, %c0_i32 : i32, i32
  }
  func.func @transform_3(%arg0: i32) -> (i32, i32) {
    %c0_i32 = arith.constant 0 : i32
    %c0_i32_0 = arith.constant 0 : i32
    %c0_i32_1 = arith.constant 0 : i32
    return %c0_i32, %c0_i32_0 : i32, i32
  }
  func.func @transform_4(%arg0: i32) -> (i32, i32) {
    %c0_i32 = arith.constant 0 : i32
    %c0_i32_0 = arith.constant 0 : i32
    %c0_i32_1 = arith.constant 0 : i32
    return %c0_i32, %c0_i32_0 : i32, i32
  }
  func.func @transform_5(%arg0: i32) -> (i32, i32) {
    %c0_i32 = arith.constant 0 : i32
    %c0_i32_0 = arith.constant 0 : i32
    %c0_i32_1 = arith.constant 0 : i32
    return %c0_i32, %c0_i32_0 : i32, i32
  }
  func.func @transform_6(%arg0: i32) -> (i32, i32) {
    %c0_i32 = arith.constant 0 : i32
    %c0_i32_0 = arith.constant 0 : i32
    %c0_i32_1 = arith.constant 0 : i32
    return %c0_i32, %c0_i32_0 : i32, i32
  }
  func.func @transform_7(%arg0: i32) -> (i32, i32) {
    %c0_i32 = arith.constant 0 : i32
    %c0_i32_0 = arith.constant 0 : i32
    %c0_i32_1 = arith.constant 0 : i32
    return %c0_i32, %c0_i32_0 : i32, i32
  }
  func.func @transform_8(%arg0: i32) -> (i32, i32) {
    %c0_i32 = arith.constant 0 : i32
    %c0_i32_0 = arith.constant 0 : i32
    %c0_i32_1 = arith.constant 0 : i32
    return %c0_i32, %c0_i32_0 : i32, i32
  }
  func.func @transform_9(%arg0: i32) -> (i32, i32) {
    %c0_i32 = arith.constant 0 : i32
    %c0_i32_0 = arith.constant 0 : i32
    %c0_i32_1 = arith.constant 0 : i32
    return %c0_i32, %c0_i32_0 : i32, i32
  }
  func.func @transform_10(%arg0: i32) -> (i32, i32) {
    %c0_i32 = arith.constant 0 : i32
    %c0_i32_0 = arith.constant 0 : i32
    %c0_i32_1 = arith.constant 0 : i32
    return %c0_i32, %c0_i32_0 : i32, i32
  }
  func.func @transform_11(%arg0: i32) -> (i32, i32) {
    %c0_i32 = arith.constant 0 : i32
    %c0_i32_0 = arith.constant 0 : i32
    return %arg0, %c0_i32 : i32, i32
  }
}

</mosaic_0001>

<bundles_post_ra>
// kernel: tpu_custom_call.1
= control target key start
LH: loop header
LB: loop body
LE: loop exit
PB: predicated region body
PF: predicated region fallthrough
CT: control target
= control target key end

     0   :  { %v39_v0 = vlaneseq  ;;  %s741_s0 = inlined_call_operand.vmem [shape: s32[2,8], index: 0, kind: input, shape index: {}]   ;;  %s742_s1 = inlined_call_operand.vmem [shape: s32[2,8], index: 1, kind: input, shape index: {}]   ;;  %s743_s2 = inlined_call_operand.vmem [shape: f32[2,8], index: 2, kind: input, shape index: {}]   ;;  %s744_s3 = inlined_call_operand.vmem [shape: f32[48,32], index: 3, kind: input, shape index: {}]   ;;  %s745_s4 = inlined_call_operand.vmem [shape: f32[8,32], index: 4, kind: input, shape index: {}]   ;;  %s746_s5 = inlined_call_operand.vmem [shape: f32[1,32], index: 5, kind: input, shape index: {}]   ;;  %s747_s6 = inlined_call_operand.vmem [shape: f32[1,32], index: 6, kind: input, shape index: {}]   ;;  %s748_s7 = inlined_call_operand.vmem [shape: f32[32,32], index: 7, kind: input, shape index: {}]   ;;  %s749_s8 = inlined_call_operand.vmem [shape: f32[1,32], index: 8, kind: input, shape index: {}]   ;;  %s750_s9 = inlined_call_operand.vmem [shape: f32[32,4], index: 9, kind: input, shape index: {}]   ;;  %s751_s10 = inlined_call_operand.vmem [shape: f32[1,4], index: 10, kind: input, shape index: {}]   ;;  %s752_s11 = inlined_call_operand.hbm [shape: f32[2,4], index: 11, kind: output, shape index: {}]  }
   0x1   :  { %v81_v1 = vld [vmem:[%s744_s3] sm:$0xff]  ;;  %v82_v2 = vld [vmem:[%s744_s3 + $0x8] sm:$0xff]  ;;  %v83_v3 = vld [vmem:[%s744_s3 + $0x10] sm:$0xff] }
   0x2   :  { %v84_v4 = vld [vmem:[%s744_s3 + $0x18] sm:$0xff]  ;;  %v43_v5 = vshrl.u32 %v39_v0, 7  ;;  %v516_v6 = vpack.c.bf16 %v82_v2, %v81_v1 }
   0x3   :  { %v520_v7 = vpack.c.bf16 %v84_v4, %v83_v3 }
   0x4   :  { %16 = vsyncpa [#allocation3], 0  ;;  %v41_v8 = vld [vmem:[%s741_s0] sm:$0x3]  ;;  %v86_v10 = vld [vmem:[%s744_s3 + $0x28] sm:$0xff]  ;;  %v661_v11 = vsub.s32 1, %v43_v5  ;;  %517 = vmatprep.subr.bf16.mxu0 %v516_v6 }
   0x5   :  { %v85_v9 = vld [vmem:[%s744_s3 + $0x20] sm:$0xff]  ;;  %v44_v12 = vsub.s32 0, %v43_v5  ;;  %519 = vmatpush3.bf16.msra.mxu0 %v516_v6  ;;  %v40_v21 = vand.u32 127, %v39_v0  ;;  %vm87_vm5 = vcmask 392192   ;;  %v576_v24 = vmov 0.0   ;;  %v263_v49 = vld [vmem:[%s748_s7 + $0x8] sm:$0xff] }
   0x6   :  { %v58_v13 = vld [vmem:[%s742_s1] sm:$0x3]  ;;  %v52_v14 = vrot.slane %v41_v8, %v661_v11  ;;  %521 = vmatprep.subr.bf16.mxu0 %v520_v7  ;;  %v524_v16 = vpack.c.bf16 %v86_v10, %v85_v9  ;;  %vm172_vm7 = vcmask 261120   ;;  %vm249_vm8 = vcmask 58368   ;;  %v264_v52 = vld [vmem:[%s748_s7 + $0x10] sm:$0xff]  ;;  %v265_v53 = vld [vmem:[%s748_s7 + $0x18] sm:$0xff] }
   0x7   :  { %v45_v15 = vrot.slane %v41_v8, %v44_v12  ;;  %v69_v17 = vrot.slane %v58_v13, %v661_v11  ;;  %v62_v18 = vrot.slane %v58_v13, %v44_v12  ;;  %v169_v27 = vld [vmem:[%s745_s4] sm:$0xff]  ;;  %v577_v51 = vmov 0.0|0.0   ;;  %s579_s1 = smov [#allocation2]  }
   0x8   :  { %54 = vbcast.lane.b32.xlu1 %v52_v14, 256  ;;  %v218_v34 = vld [vmem:[%s743_s2] sm:$0x3]  ;;  %528 = vmatprep.subr.bf16.mxu1 %v577_v51  ;;  %v532_v54 = vpack.c.bf16 %v265_v53, %v264_v52  ;;  %vm578_vm9 = vmmov 0   ;;  %vm276_vm10 = vcmask 1041409   ;;  %s443_s3 = sshll.u32 %s579_s1, 4  ;;  %s444_s3 = int_to_ptr.vmem [resolvable:$true] %s443_s3 }
   0x9   :  { %47 = vbcast.lane.b32.xlu0 %v45_v15, 256  ;;  %523 = vmatpush3.bf16.msra.mxu0 %v520_v7  ;;  %v250_v35 = vsel %vm249_vm8, %v218_v34, 0.0  ;;  %v222_v36 = vrot.slane %v218_v34, %v44_v12  ;;  %v229_v47 = vrot.slane %v218_v34, %v661_v11  ;;  %v262_v48 = vld [vmem:[%s748_s7] sm:$0xff]  ;;  %vm435_vm11 = vcmask 25600   ;;  %p557_p1 = scmp.lt.s32.totalorder %s444_s3, %s444_s3 }
   0xa   :  { %525 = vmatprep.subr.bf16.mxu0 %v524_v16  ;;  %v529_v50 = vpack.c.bf16 %v263_v49, %v262_v48  ;;  %502 = vmatprep.mubr.msk.f32.mxu1 %vm578_vm9, %v576_v24  ;;  %v455_v63 = vld [vmem:[%s746_s5] ss:$0 sm:$0xff] }
   0xb   :  { %v456_v2 = vld [vmem:[%s747_s6] ss:$0 sm:$0xff] }
   0xc   :  { %71 = vbcast.lane.b32.xlu1 %v69_v17, 256  ;;  %530 = vmatpush3.bf16.msra.mxu1 %v529_v50 }
   0xd   :  { %64 = vbcast.lane.b32.xlu0 %v62_v18, 256  ;;  %527 = vmatpush3.bf16.msra.mxu0 %v524_v16 }
   0xe   :  { %531 = vmatprep.subr.bf16.mxu1 %v577_v51 }
  0x10   :  { %533 = vmatpush3.bf16.msra.mxu1 %v532_v54 }
  0x11   :  { %534 = vmatprep.subr.bf16.mxu1 %v577_v51 }
  0x7a   :  { %v55_v19 = vpop.permute.xlu1 %54 }
  0x7b   :  { %v48_v20 = vpop.permute.xlu0 %47  ;;  %vm57_vm0 = vcmp.eq.s32.totalorder %v55_v19, %v40_v21 }
  0x7c   :  { %vm56_vm3 = vcmp.eq.s32.totalorder %v48_v20, %v40_v21 }
  0x7e   :  { %v72_v22 = vpop.permute.xlu1 %71 }
  0x7f   :  { %v65_v23 = vpop.permute.xlu0 %64  ;;  %vm74_vm1 = vcmp.eq.s32.totalorder %v72_v22, %v40_v21 }
  0x80   :  { %vm73_vm2 = vcmp.eq.s32.totalorder %v65_v23, %v40_v21  ;;  %vm76_vm4 = vmor %vm57_vm0, %vm74_vm1 }
  0x81   :  { %v452_v25 = vsel %vm76_vm4, 1.0, %v576_v24  ;;  %vm75_vm6 = vmor %vm56_vm3, %vm73_vm2 }
  0x82   :  { %v451_v26 = vsel %vm75_vm6, 1.0, %v576_v24 }
  0x83   :  { %491 = vmatprep.mubr.msk.f32.mxu0 %vm87_vm5, %v451_v26 }
  0x84   :  { %492 = vmatmul.mubr.msk.f32.vlgmr.msra.gmra.mrb[0].mxu0 %vm87_vm5, %v452_v25 }
 0x157   :  { %v493_v28 = vpop.f32.mrb[0].mxu0 }
 0x158   :  { %v171_v29 = vadd.f32 %v493_v28, %v169_v27  ;;  %v160_v30 = vpop.f32.mrb[1].mxu0 }
 0x159   :  { %v170_v31 = vadd.f32 %v169_v27, %v160_v30  ;;  %v351_v30 = vld [vmem:[%s750_s9] sm:$0xff] }
 0x15a   :  { %v176_v32 = vsel %vm172_vm7, %v171_v29, 0.0 }
 0x15b   :  { %177 = vadd.xlane.f32.xlu0 %v176_v32  ;;  %v173_v33 = vsel %vm172_vm7, %v170_v31, 0.0 }
 0x15c   :  { %174 = vadd.xlane.f32.xlu1 %v173_v33 }
 0x160   :  { %251 = vadd.xlane.f32.xlu1 %v250_v35 }
 0x171   :  { %224 = vbcast.lane.b32.xlu1 %v222_v36, 256 }
 0x1e8   :  { %v178_v37 = vpop.xlane.xlu0 %177 }
 0x1e9   :  { %v181_v38 = vmul.f32 0.03125, %v178_v37  ;;  %v175_v39 = vpop.xlane.xlu1 %174 }
 0x1ea   :  { %v180_v40 = vmul.f32 0.03125, %v175_v39  ;;  %v354_v39 = vld [vmem:[%s750_s9 + $0x18] sm:$0xff] }
 0x1eb   :  { %v183_v41 = vsub.f32 %v171_v29, %v181_v38  ;;  %v353_v38 = vld [vmem:[%s750_s9 + $0x10] sm:$0xff] }
 0x1ec   :  { %v182_v42 = vsub.f32 %v170_v31, %v180_v40  ;;  %v352_v31 = vld [vmem:[%s750_s9 + $0x8] sm:$0xff]  ;;  %v538_v40 = vpack.c.bf16 %v354_v39, %v353_v38  ;;  %s552_s9 = scalar_lea.vmem %s444_s3, 32 }
 0x1ed   :  { %v185_v43 = vmul.f32 %v183_v41, %v183_v41  ;;  %v252_v61 = vpop.xlane.xlu1 %251  ;;  %v535_v36 = vpack.c.bf16 %v352_v31, %v351_v30  ;;  %p553_p0 = scmp.ne.s32.totalorder %s444_s3, %s552_s9  ;;  %p558_p2 = scmp.lt.s32.totalorder %s552_s9, %s552_s9 }
 0x1ee   :  { %v184_v45 = vmul.f32 %v182_v42, %v182_v42  ;;  %v253_v1 = vmax.f32 %v252_v61, 1.0 }
 0x1ef   :  { %v189_v44 = vsel %vm172_vm7, %v185_v43, 0.0  ;;  %p559_p3 = por %p558_p2, %p557_p1 }
 0x1f0   :  { %190 = vadd.xlane.f32.xlu0 %v189_v44  ;;  %v186_v46 = vsel %vm172_vm7, %v184_v45, 0.0  ;;  %v255_v7 = vrot.slane %v253_v1, 1  ;;  %v459_v45 = vld [vmem:[%s751_s10] ss:$0 sm:$0xff] }
 0x1f1   :  { %v225_v11 = vpop.permute.xlu1 %224  ;;  %p560_p4 = pnand %p559_p3, %p553_p0 }
 0x1f4   :  { %187 = vadd.xlane.f32.xlu0 %v186_v46 }
 0x20a   :  { %231 = vbcast.lane.b32.xlu0 %v229_v47, 256 }
 0x27d   :  { %v191_v55 = vpop.xlane.xlu0 %190 }
 0x27e   :  { %v193_v56 = vmul.f32 0.03125, %v191_v55 }
 0x280   :  { %v195_v57 = vadd.f32 1e-12, %v193_v56 }
 0x281   :  { %v188_v58 = vpop.xlane.xlu0 %187 }
 0x282   :  { %544 = vrsqrt.f32 %v195_v57  ;;  %v192_v59 = vmul.f32 0.03125, %v188_v58 }
 0x284   :  { %v194_v60 = vadd.f32 1e-12, %v192_v59 }
 0x285   :  { %v232_v5 = vpop.permute.xlu0 %231 }
 0x286   :  { %546 = vrsqrt.f32 %v194_v60 }
 0x287   :  { %548 = vrcp.f32 %v255_v7 }
 0x288   :  { %550 = vrcp.f32 %v253_v1 }
 0x28c   :  { %v545_v62 = vpop.eup %544 }
 0x28d   :  { %v199_v0 = vmul.f32 %v545_v62, %v183_v41  ;;  %v457_v41 = vld [vmem:[%s749_s8] ss:$0 sm:$0xff] }
 0x28f   :  { %v208_v3 = vmul.f32 %v455_v63, %v199_v0 }
 0x290   :  { %v547_v4 = vpop.eup %546 }
 0x291   :  { %v217_v6 = vadd.f32 %v456_v2, %v208_v3  ;;  %v198_v8 = vmul.f32 %v547_v4, %v182_v42  ;;  %v549_v25 = vpop.eup %548 }
 0x292   :  { %v551_v33 = vpop.eup %550 }
 0x293   :  { %v234_v9 = vmul.f32 %v232_v5, %v217_v6  ;;  %v207_v10 = vmul.f32 %v455_v63, %v198_v8 }
 0x295   :  { %v242_v12 = vsel %vm172_vm7, %v234_v9, 0.0  ;;  %v216_v13 = vadd.f32 %v456_v2, %v207_v10 }
 0x296   :  { %v243_v14 = vrot.slane %v242_v12, 4 }
 0x297   :  { %v233_v15 = vmul.f32 %v225_v11, %v216_v13 }
 0x298   :  { %v244_v16 = vadd.f32 %v243_v14, %v242_v12 }
 0x299   :  { %v235_v17 = vsel %vm172_vm7, %v233_v15, 0.0 }
 0x29a   :  { %v245_v18 = vrot.slane %v244_v16, 2  ;;  %v236_v19 = vrot.slane %v235_v17, 4 }
 0x29c   :  { %v246_v20 = vadd.f32 %v245_v18, %v244_v16  ;;  %v237_v21 = vadd.f32 %v236_v19, %v235_v17 }
 0x29e   :  { %v247_v22 = vrot.slane %v246_v20, 1  ;;  %v238_v23 = vrot.slane %v237_v21, 2 }
 0x2a0   :  { %v248_v26 = vadd.f32 %v247_v22, %v246_v20  ;;  %v239_v27 = vadd.f32 %v238_v23, %v237_v21 }
 0x2a2   :  { %v240_v28 = vrot.slane %v239_v27, 1  ;;  %v261_v29 = vmul.f32 %v549_v25, %v248_v26 }
 0x2a4   :  { %v241_v32 = vadd.f32 %v240_v28, %v239_v27  ;;  %v275_v35 = vrot.slane %v261_v29, 7 }
 0x2a6   :  { %v259_v34 = vmul.f32 %v551_v33, %v241_v32 }
 0x2a8   :  { %v277_v37 = vsel %vm276_vm10, %v275_v35, %v259_v34 }
 0x2a9   :  { %503 = vmatmul.mubr.msk.f32.vlgmr.msra.gmra.mrb[0].mxu1 %vm172_vm7, %v277_v37 }
 0x2aa   :  { %536 = vmatpush3.bf16.msra.mxu1 %v535_v36  ;;  %513 = vmatprep.mubr.msk.f32.mxu1 %vm578_vm9, %v576_v24 }
 0x2ab   :  { %537 = vmatprep.subr.bf16.mxu1 %v577_v51 }
 0x2ae   :  { %539 = vmatpush3.bf16.msra.mxu1 %v538_v40 }
 0x37c   :  { %v346_v42 = vpop.f32.mrb[0].mxu1 }
 0x37d   :  { %v347_v43 = vadd.f32 %v457_v41, %v346_v42  ;;  %v504_v44 = vpop.f32.mrb[1].mxu1 }
 0x37f   :  { %v350_v24 = vmax.f32 %v347_v43, 0.0 }
 0x381   :  { %514 = vmatmul.mubr.msk.f32.vlgmr.msra.gmra.mrb[2].mxu1 %vm172_vm7, %v350_v24 }
 0x454   :  { %v431_v46 = vpop.f32.mrb[2].mxu1 }
 0x455   :  { %v432_v47 = vadd.f32 %v459_v45, %v431_v46  ;;  %v515_v48 = vpop.f32.mrb[3].mxu1 }
 0x457   :  { %436 = vst.msk [vmem:[#allocation2] sm:$0x3] %vm435_vm11, %v432_v47 }
 0x458   :  { %563 = shalt.err (!%p560_p4)
}
 0x459   :  { %s564_s2 = scalar_lea.hbm %s752_s11, 32 }
 0x45a   :  { %p565_p5 = scmp.ne.s32.totalorder %s752_s11, %s564_s2  ;;  %p568_p6 = scmp.lt.u32.totalorder %s564_s2, %s752_s11 }
 0x45c   :  { %p570_p7 = pnand %p568_p6, %p565_p5 }
 0x45e   :  { %573 = shalt.err (!%p570_p7)
}
 0x45f   :  { %446 = dma.vmem_to_hbm [thread:$0]  %s444_s3, 32, %s752_s11, [#allocation3]  }
 0x460   :  { %574 = dma.done.wait [#allocation3], 32  }
 0x461   :  { %575 = vsyncadd [#allocation3], 4294967264 }
 0x462   :  { %450 = vsyncpa [#allocation3], 1 }

</bundles_post_ra>
